<compile_context>
chip_gen: v5e
topology: v5e:2x2
jax: 0.10.0
libtpu: 0.0.40
codegen_flags: <defaults>
</compile_context>

<pallas_src>
import functools

import jax
import jax.numpy as jnp
import numpy as np
from jax import lax
from jax.experimental import pallas as pl
from jax.experimental.pallas import tpu as pltpu


def _shift(a, off):
    """z[:, p] = a[:, p + off]; zero-filled past the ends of the flattened plane."""
    c = a.shape[0]
    zeros = jnp.zeros((c, abs(off)), a.dtype)
    if off > 0:
        return jnp.concatenate([a[:, off:], zeros], axis=1)
    return jnp.concatenate([zeros, a[:, :off]], axis=1)


def _lska_kernel(x_ref, w0h_ref, b0h_ref, w0v_ref, b0v_ref,
                 wsh_ref, bsh_ref, wsv_ref, bsv_ref, w1_ref, b1_ref,
                 o_ref, *, H, W):
    f32 = jnp.float32
    HW = H * W
    x = x_ref[0]                                   # (C, H*W), lane-dense

    # Column index of every flattened position; used to zero the taps of the
    # horizontal convs that would cross a row boundary.  Vertical taps are
    # handled by _shift's zero fill at the plane boundary.
    col = lax.broadcasted_iota(jnp.int32, (1, HW), 1) % W

    def conv_h(a, w_ref, b_ref, d):
        # depthwise (1, 3) conv, dilation d, padding d -> taps at w-d, w, w+d
        w = w_ref[...]                                     # (C, 3)
        lo = _shift(a, -d) * (col >= d).astype(f32)        # value at column w-d
        hi = _shift(a, d) * (col < W - d).astype(f32)      # value at column w+d
        return w[:, 0:1] * lo + w[:, 1:2] * a + w[:, 2:3] * hi + b_ref[...]

    def conv_v(a, w_ref, b_ref, d):
        # depthwise (3, 1) conv, dilation d, padding d -> taps at h-d, h, h+d
        w = w_ref[...]                                     # (C, 3)
        lo = _shift(a, -d * W)                             # value at row h-d
        hi = _shift(a, d * W)                              # value at row h+d
        return w[:, 0:1] * lo + w[:, 1:2] * a + w[:, 2:3] * hi + b_ref[...]

    # Depthwise separable chain, vectorized over all channels at once (VPU).
    a = conv_h(x, w0h_ref, b0h_ref, 1)      # conv0h        (1,3), pad 1
    a = conv_v(a, w0v_ref, b0v_ref, 1)      # conv0v        (3,1), pad 1
    a = conv_h(a, wsh_ref, bsh_ref, 2)      # conv_spatial_h (1,3), dil 2
    a = conv_v(a, wsv_ref, bsv_ref, 2)      # conv_spatial_v (3,1), dil 2

    # 1x1 channel mix as a single MXU matmul, then gate with the input.
    attn = jnp.dot(w1_ref[...], a, preferred_element_type=f32) + b1_ref[...]
    o_ref[0] = (x * attn).astype(o_ref.dtype)


def lska_pallas(x, p):
    N, C, H, W = x.shape
    HW = H * W
    xf = x.reshape(N, C, HW).astype(jnp.float32)

    def rep(shape):
        # Whole (small) parameter array, VMEM-resident each grid step.
        return pl.BlockSpec(shape, lambda n: (0,) * len(shape))

    kernel = functools.partial(_lska_kernel, H=H, W=W)

    out = pl.pallas_call(
        kernel,
        out_shape=jax.ShapeDtypeStruct((N, C, HW), jnp.float32),
        grid=(N,),
        in_specs=[pl.BlockSpec((1, C, HW), lambda n: (n, 0, 0)),
                  rep((C, 3)), rep((C, 1)),
                  rep((C, 3)), rep((C, 1)),
                  rep((C, 3)), rep((C, 1)),
                  rep((C, 3)), rep((C, 1)),
                  rep((C, C)), rep((C, 1))],
        out_specs=pl.BlockSpec((1, C, HW), lambda n: (n, 0, 0)),
        compiler_params=pltpu.CompilerParams(
            dimension_semantics=("parallel",)),
    )(xf,
      p["w0h"], p["b0h"].reshape(C, 1),
      p["w0v"], p["b0v"].reshape(C, 1),
      p["wsh"], p["bsh"].reshape(C, 1),
      p["wsv"], p["bsv"].reshape(C, 1),
      p["w1"], p["b1"].reshape(C, 1))
    return out.reshape(N, C, H, W)


def lska_ref(x, p):
    """Pure-JAX reference matching the PyTorch LSKA(k_size=7) forward."""
    C = x.shape[1]

    def dw(a, w, b, pad, dil):
        y = lax.conv_general_dilated(
            a, w, window_strides=(1, 1), padding=pad, rhs_dilation=dil,
            dimension_numbers=("NCHW", "OIHW", "NCHW"), feature_group_count=C)
        return y + b.reshape(1, C, 1, 1)

    a = dw(x, p["w0h"].reshape(C, 1, 1, 3), p["b0h"], ((0, 0), (1, 1)), (1, 1))
    a = dw(a, p["w0v"].reshape(C, 1, 3, 1), p["b0v"], ((1, 1), (0, 0)), (1, 1))
    a = dw(a, p["wsh"].reshape(C, 1, 1, 3), p["bsh"], ((0, 0), (2, 2)), (1, 2))
    a = dw(a, p["wsv"].reshape(C, 1, 3, 1), p["bsv"], ((2, 2), (0, 0)), (2, 1))
    a = lax.conv_general_dilated(
        a, p["w1"].reshape(C, C, 1, 1), (1, 1), ((0, 0), (0, 0)),
        dimension_numbers=("NCHW", "OIHW", "NCHW")) + p["b1"].reshape(1, C, 1, 1)
    return x * a


if __name__ == "__main__":
    key = jax.random.PRNGKey(0)
    N, C, H, W = 2, 4, 16, 16
    keys = jax.random.split(key, 11)

    x = jax.random.normal(keys[0], (N, C, H, W), jnp.float32)
    params = {
        "w0h": jax.random.normal(keys[1], (C, 3), jnp.float32) * 0.3,
        "b0h": jax.random.normal(keys[2], (C,), jnp.float32) * 0.1,
        "w0v": jax.random.normal(keys[3], (C, 3), jnp.float32) * 0.3,
        "b0v": jax.random.normal(keys[4], (C,), jnp.float32) * 0.1,
        "wsh": jax.random.normal(keys[5], (C, 3), jnp.float32) * 0.3,
        "bsh": jax.random.normal(keys[6], (C,), jnp.float32) * 0.1,
        "wsv": jax.random.normal(keys[7], (C, 3), jnp.float32) * 0.3,
        "bsv": jax.random.normal(keys[8], (C,), jnp.float32) * 0.1,
        "w1": jax.random.normal(keys[9], (C, C), jnp.float32) * 0.3,
        "b1": jax.random.normal(keys[10], (C,), jnp.float32) * 0.1,
    }

    out = jax.block_until_ready(lska_pallas(x, params))
    ref = lska_ref(x, params)

    assert out.shape == (N, C, H, W)
    if not np.allclose(np.asarray(out), np.asarray(ref), rtol=1e-4, atol=1e-4):
        raise AssertionError("Pallas LSKA output mismatch vs JAX reference")
    print("KERNEL_OK")
</pallas_src>

<mosaic_0001>
module attributes {stable_mosaic.version = 11 : i64} {
  func.func @_lska_kernel(%arg0: i32, %arg1: memref<1x4x256xf32, #tpu.memory_space<vmem>>, %arg2: memref<4x3xf32, #tpu.memory_space<vmem>>, %arg3: memref<4x1xf32, #tpu.memory_space<vmem>>, %arg4: memref<4x3xf32, #tpu.memory_space<vmem>>, %arg5: memref<4x1xf32, #tpu.memory_space<vmem>>, %arg6: memref<4x3xf32, #tpu.memory_space<vmem>>, %arg7: memref<4x1xf32, #tpu.memory_space<vmem>>, %arg8: memref<4x3xf32, #tpu.memory_space<vmem>>, %arg9: memref<4x1xf32, #tpu.memory_space<vmem>>, %arg10: memref<4x4xf32, #tpu.memory_space<vmem>>, %arg11: memref<4x1xf32, #tpu.memory_space<vmem>>, %arg12: memref<1x4x256xf32, #tpu.memory_space<vmem>>) attributes {dimension_semantics = [#tpu.dimension_semantics<parallel>], iteration_bounds = array<i64: 2>, scalar_prefetch = 0 : i64, scratch_operands = 0 : i64, tpu.core_type = #tpu.core_type<tc>, window_params = [{transform_indices = @transform_0, window_bounds = array<i64: 1, 4, 256>}, {pipeline_mode = #tpu.pipeline_mode<synchronous>, transform_indices = @transform_1, window_bounds = array<i64: 4, 3>}, {pipeline_mode = #tpu.pipeline_mode<synchronous>, transform_indices = @transform_2, window_bounds = array<i64: 4, 1>}, {pipeline_mode = #tpu.pipeline_mode<synchronous>, transform_indices = @transform_3, window_bounds = array<i64: 4, 3>}, {pipeline_mode = #tpu.pipeline_mode<synchronous>, transform_indices = @transform_4, window_bounds = array<i64: 4, 1>}, {pipeline_mode = #tpu.pipeline_mode<synchronous>, transform_indices = @transform_5, window_bounds = array<i64: 4, 3>}, {pipeline_mode = #tpu.pipeline_mode<synchronous>, transform_indices = @transform_6, window_bounds = array<i64: 4, 1>}, {pipeline_mode = #tpu.pipeline_mode<synchronous>, transform_indices = @transform_7, window_bounds = array<i64: 4, 3>}, {pipeline_mode = #tpu.pipeline_mode<synchronous>, transform_indices = @transform_8, window_bounds = array<i64: 4, 1>}, {pipeline_mode = #tpu.pipeline_mode<synchronous>, transform_indices = @transform_9, window_bounds = array<i64: 4, 4>}, {pipeline_mode = #tpu.pipeline_mode<synchronous>, transform_indices = @transform_10, window_bounds = array<i64: 4, 1>}, {transform_indices = @transform_11, window_bounds = array<i64: 1, 4, 256>}]} {
    %c0 = arith.constant 0 : index
    %c0_0 = arith.constant 0 : index
    %c0_1 = arith.constant 0 : index
    %0 = vector.load %arg1[%c0, %c0_0, %c0_1] : memref<1x4x256xf32, #tpu.memory_space<vmem>>, vector<1x4x256xf32>
    %1 = vector.shape_cast %0 : vector<1x4x256xf32> to vector<4x256xf32>
    %2 = tpu.iota {dimensions = array<i32: 1>} : vector<1x256xi32>
    %c16_i32 = arith.constant 16 : i32
    %c0_i32 = arith.constant 0 : i32
    %3 = arith.cmpi eq, %c16_i32, %c0_i32 : i32
    %c1_i32 = arith.constant 1 : i32
    %4 = arith.select %3, %c1_i32, %c16_i32 : i32
    %5 = vector.broadcast %4 : i32 to vector<1x256xi32>
    %6 = arith.remsi %2, %5 : vector<1x256xi32>
    %c0_i32_2 = arith.constant 0 : i32
    %7 = vector.broadcast %c0_i32_2 : i32 to vector<1x256xi32>
    %8 = arith.cmpi ne, %6, %7 : vector<1x256xi32>
    %c0_i32_3 = arith.constant 0 : i32
    %9 = vector.broadcast %c0_i32_3 : i32 to vector<1x256xi32>
    %10 = arith.cmpi slt, %6, %9 : vector<1x256xi32>
    %c0_i32_4 = arith.constant 0 : i32
    %11 = arith.cmpi slt, %4, %c0_i32_4 : i32
    %12 = vector.broadcast %11 : i1 to vector<1x256xi1>
    %13 = vector.broadcast %12 : vector<1x256xi1> to vector<1x256xi1>
    %14 = arith.xori %10, %13 : vector<1x256xi1>
    %15 = arith.andi %14, %8 : vector<1x256xi1>
    %16 = vector.broadcast %4 : i32 to vector<1x256xi32>
    %17 = arith.addi %6, %16 : vector<1x256xi32>
    %18 = arith.select %15, %17, %6 : vector<1x256xi1>, vector<1x256xi32>
    %c0_5 = arith.constant 0 : index
    %c0_6 = arith.constant 0 : index
    %19 = vector.load %arg2[%c0_5, %c0_6] : memref<4x3xf32, #tpu.memory_space<vmem>>, vector<4x3xf32>
    %cst = arith.constant 0.000000e+00 : f32
    %20 = vector.broadcast %cst : f32 to vector<4x1xf32>
    %21 = vector.extract_strided_slice %1 {offsets = [0, 0], sizes = [4, 255], strides = [1, 1]} : vector<4x256xf32> to vector<4x255xf32>
    %22 = tpu.concatenate %20, %21 in 1 : vector<4x1xf32>, vector<4x255xf32> -> vector<4x256xf32>
    %c1_i32_7 = arith.constant 1 : i32
    %23 = vector.broadcast %c1_i32_7 : i32 to vector<1x256xi32>
    %24 = arith.cmpi sge, %18, %23 : vector<1x256xi32>
    %25 = arith.extui %24 : vector<1x256xi1> to vector<1x256xi32>
    %26 = arith.sitofp %25 : vector<1x256xi32> to vector<1x256xf32>
    %27 = vector.broadcast %26 : vector<1x256xf32> to vector<4x256xf32>
    %28 = arith.mulf %22, %27 : vector<4x256xf32>
    %cst_8 = arith.constant 0.000000e+00 : f32
    %29 = vector.broadcast %cst_8 : f32 to vector<4x1xf32>
    %30 = vector.extract_strided_slice %1 {offsets = [0, 1], sizes = [4, 255], strides = [1, 1]} : vector<4x256xf32> to vector<4x255xf32>
    %31 = tpu.concatenate %30, %29 in 1 : vector<4x255xf32>, vector<4x1xf32> -> vector<4x256xf32>
    %c15_i32 = arith.constant 15 : i32
    %32 = vector.broadcast %c15_i32 : i32 to vector<1x256xi32>
    %33 = arith.cmpi slt, %18, %32 : vector<1x256xi32>
    %34 = arith.extui %33 : vector<1x256xi1> to vector<1x256xi32>
    %35 = arith.sitofp %34 : vector<1x256xi32> to vector<1x256xf32>
    %36 = vector.broadcast %35 : vector<1x256xf32> to vector<4x256xf32>
    %37 = arith.mulf %31, %36 : vector<4x256xf32>
    %38 = vector.extract_strided_slice %19 {offsets = [0, 0], sizes = [4, 1], strides = [1, 1]} : vector<4x3xf32> to vector<4x1xf32>
    %39 = vector.broadcast %38 : vector<4x1xf32> to vector<4x256xf32>
    %40 = arith.mulf %39, %28 : vector<4x256xf32>
    %41 = vector.extract_strided_slice %19 {offsets = [0, 1], sizes = [4, 1], strides = [1, 1]} : vector<4x3xf32> to vector<4x1xf32>
    %42 = vector.broadcast %41 : vector<4x1xf32> to vector<4x256xf32>
    %43 = arith.mulf %42, %1 : vector<4x256xf32>
    %44 = arith.addf %40, %43 : vector<4x256xf32>
    %45 = vector.extract_strided_slice %19 {offsets = [0, 2], sizes = [4, 1], strides = [1, 1]} : vector<4x3xf32> to vector<4x1xf32>
    %46 = vector.broadcast %45 : vector<4x1xf32> to vector<4x256xf32>
    %47 = arith.mulf %46, %37 : vector<4x256xf32>
    %48 = arith.addf %44, %47 : vector<4x256xf32>
    %c0_9 = arith.constant 0 : index
    %c0_10 = arith.constant 0 : index
    %49 = vector.load %arg3[%c0_9, %c0_10] : memref<4x1xf32, #tpu.memory_space<vmem>>, vector<4x1xf32>
    %50 = vector.broadcast %49 : vector<4x1xf32> to vector<4x256xf32>
    %51 = arith.addf %48, %50 : vector<4x256xf32>
    %c0_11 = arith.constant 0 : index
    %c0_12 = arith.constant 0 : index
    %52 = vector.load %arg4[%c0_11, %c0_12] : memref<4x3xf32, #tpu.memory_space<vmem>>, vector<4x3xf32>
    %cst_13 = arith.constant 0.000000e+00 : f32
    %53 = vector.broadcast %cst_13 : f32 to vector<4x16xf32>
    %54 = vector.extract_strided_slice %51 {offsets = [0, 0], sizes = [4, 240], strides = [1, 1]} : vector<4x256xf32> to vector<4x240xf32>
    %55 = tpu.concatenate %53, %54 in 1 : vector<4x16xf32>, vector<4x240xf32> -> vector<4x256xf32>
    %cst_14 = arith.constant 0.000000e+00 : f32
    %56 = vector.broadcast %cst_14 : f32 to vector<4x16xf32>
    %57 = vector.extract_strided_slice %51 {offsets = [0, 16], sizes = [4, 240], strides = [1, 1]} : vector<4x256xf32> to vector<4x240xf32>
    %58 = tpu.concatenate %57, %56 in 1 : vector<4x240xf32>, vector<4x16xf32> -> vector<4x256xf32>
    %59 = vector.extract_strided_slice %52 {offsets = [0, 0], sizes = [4, 1], strides = [1, 1]} : vector<4x3xf32> to vector<4x1xf32>
    %60 = vector.broadcast %59 : vector<4x1xf32> to vector<4x256xf32>
    %61 = arith.mulf %60, %55 : vector<4x256xf32>
    %62 = vector.extract_strided_slice %52 {offsets = [0, 1], sizes = [4, 1], strides = [1, 1]} : vector<4x3xf32> to vector<4x1xf32>
    %63 = vector.broadcast %62 : vector<4x1xf32> to vector<4x256xf32>
    %64 = arith.mulf %63, %51 : vector<4x256xf32>
    %65 = arith.addf %61, %64 : vector<4x256xf32>
    %66 = vector.extract_strided_slice %52 {offsets = [0, 2], sizes = [4, 1], strides = [1, 1]} : vector<4x3xf32> to vector<4x1xf32>
    %67 = vector.broadcast %66 : vector<4x1xf32> to vector<4x256xf32>
    %68 = arith.mulf %67, %58 : vector<4x256xf32>
    %69 = arith.addf %65, %68 : vector<4x256xf32>
    %c0_15 = arith.constant 0 : index
    %c0_16 = arith.constant 0 : index
    %70 = vector.load %arg5[%c0_15, %c0_16] : memref<4x1xf32, #tpu.memory_space<vmem>>, vector<4x1xf32>
    %71 = vector.broadcast %70 : vector<4x1xf32> to vector<4x256xf32>
    %72 = arith.addf %69, %71 : vector<4x256xf32>
    %c0_17 = arith.constant 0 : index
    %c0_18 = arith.constant 0 : index
    %73 = vector.load %arg6[%c0_17, %c0_18] : memref<4x3xf32, #tpu.memory_space<vmem>>, vector<4x3xf32>
    %cst_19 = arith.constant 0.000000e+00 : f32
    %74 = vector.broadcast %cst_19 : f32 to vector<4x2xf32>
    %75 = vector.extract_strided_slice %72 {offsets = [0, 0], sizes = [4, 254], strides = [1, 1]} : vector<4x256xf32> to vector<4x254xf32>
    %76 = tpu.concatenate %74, %75 in 1 : vector<4x2xf32>, vector<4x254xf32> -> vector<4x256xf32>
    %c2_i32 = arith.constant 2 : i32
    %77 = vector.broadcast %c2_i32 : i32 to vector<1x256xi32>
    %78 = arith.cmpi sge, %18, %77 : vector<1x256xi32>
    %79 = arith.extui %78 : vector<1x256xi1> to vector<1x256xi32>
    %80 = arith.sitofp %79 : vector<1x256xi32> to vector<1x256xf32>
    %81 = vector.broadcast %80 : vector<1x256xf32> to vector<4x256xf32>
    %82 = arith.mulf %76, %81 : vector<4x256xf32>
    %cst_20 = arith.constant 0.000000e+00 : f32
    %83 = vector.broadcast %cst_20 : f32 to vector<4x2xf32>
    %84 = vector.extract_strided_slice %72 {offsets = [0, 2], sizes = [4, 254], strides = [1, 1]} : vector<4x256xf32> to vector<4x254xf32>
    %85 = tpu.concatenate %84, %83 in 1 : vector<4x254xf32>, vector<4x2xf32> -> vector<4x256xf32>
    %c14_i32 = arith.constant 14 : i32
    %86 = vector.broadcast %c14_i32 : i32 to vector<1x256xi32>
    %87 = arith.cmpi slt, %18, %86 : vector<1x256xi32>
    %88 = arith.extui %87 : vector<1x256xi1> to vector<1x256xi32>
    %89 = arith.sitofp %88 : vector<1x256xi32> to vector<1x256xf32>
    %90 = vector.broadcast %89 : vector<1x256xf32> to vector<4x256xf32>
    %91 = arith.mulf %85, %90 : vector<4x256xf32>
    %92 = vector.extract_strided_slice %73 {offsets = [0, 0], sizes = [4, 1], strides = [1, 1]} : vector<4x3xf32> to vector<4x1xf32>
    %93 = vector.broadcast %92 : vector<4x1xf32> to vector<4x256xf32>
    %94 = arith.mulf %93, %82 : vector<4x256xf32>
    %95 = vector.extract_strided_slice %73 {offsets = [0, 1], sizes = [4, 1], strides = [1, 1]} : vector<4x3xf32> to vector<4x1xf32>
    %96 = vector.broadcast %95 : vector<4x1xf32> to vector<4x256xf32>
    %97 = arith.mulf %96, %72 : vector<4x256xf32>
    %98 = arith.addf %94, %97 : vector<4x256xf32>
    %99 = vector.extract_strided_slice %73 {offsets = [0, 2], sizes = [4, 1], strides = [1, 1]} : vector<4x3xf32> to vector<4x1xf32>
    %100 = vector.broadcast %99 : vector<4x1xf32> to vector<4x256xf32>
    %101 = arith.mulf %100, %91 : vector<4x256xf32>
    %102 = arith.addf %98, %101 : vector<4x256xf32>
    %c0_21 = arith.constant 0 : index
    %c0_22 = arith.constant 0 : index
    %103 = vector.load %arg7[%c0_21, %c0_22] : memref<4x1xf32, #tpu.memory_space<vmem>>, vector<4x1xf32>
    %104 = vector.broadcast %103 : vector<4x1xf32> to vector<4x256xf32>
    %105 = arith.addf %102, %104 : vector<4x256xf32>
    %c0_23 = arith.constant 0 : index
    %c0_24 = arith.constant 0 : index
    %106 = vector.load %arg8[%c0_23, %c0_24] : memref<4x3xf32, #tpu.memory_space<vmem>>, vector<4x3xf32>
    %cst_25 = arith.constant 0.000000e+00 : f32
    %107 = vector.broadcast %cst_25 : f32 to vector<4x32xf32>
    %108 = vector.extract_strided_slice %105 {offsets = [0, 0], sizes = [4, 224], strides = [1, 1]} : vector<4x256xf32> to vector<4x224xf32>
    %109 = tpu.concatenate %107, %108 in 1 : vector<4x32xf32>, vector<4x224xf32> -> vector<4x256xf32>
    %cst_26 = arith.constant 0.000000e+00 : f32
    %110 = vector.broadcast %cst_26 : f32 to vector<4x32xf32>
    %111 = vector.extract_strided_slice %105 {offsets = [0, 32], sizes = [4, 224], strides = [1, 1]} : vector<4x256xf32> to vector<4x224xf32>
    %112 = tpu.concatenate %111, %110 in 1 : vector<4x224xf32>, vector<4x32xf32> -> vector<4x256xf32>
    %113 = vector.extract_strided_slice %106 {offsets = [0, 0], sizes = [4, 1], strides = [1, 1]} : vector<4x3xf32> to vector<4x1xf32>
    %114 = vector.broadcast %113 : vector<4x1xf32> to vector<4x256xf32>
    %115 = arith.mulf %114, %109 : vector<4x256xf32>
    %116 = vector.extract_strided_slice %106 {offsets = [0, 1], sizes = [4, 1], strides = [1, 1]} : vector<4x3xf32> to vector<4x1xf32>
    %117 = vector.broadcast %116 : vector<4x1xf32> to vector<4x256xf32>
    %118 = arith.mulf %117, %105 : vector<4x256xf32>
    %119 = arith.addf %115, %118 : vector<4x256xf32>
    %120 = vector.extract_strided_slice %106 {offsets = [0, 2], sizes = [4, 1], strides = [1, 1]} : vector<4x3xf32> to vector<4x1xf32>
    %121 = vector.broadcast %120 : vector<4x1xf32> to vector<4x256xf32>
    %122 = arith.mulf %121, %112 : vector<4x256xf32>
    %123 = arith.addf %119, %122 : vector<4x256xf32>
    %c0_27 = arith.constant 0 : index
    %c0_28 = arith.constant 0 : index
    %124 = vector.load %arg9[%c0_27, %c0_28] : memref<4x1xf32, #tpu.memory_space<vmem>>, vector<4x1xf32>
    %125 = vector.broadcast %124 : vector<4x1xf32> to vector<4x256xf32>
    %126 = arith.addf %123, %125 : vector<4x256xf32>
    %c0_29 = arith.constant 0 : index
    %c0_30 = arith.constant 0 : index
    %127 = vector.load %arg10[%c0_29, %c0_30] : memref<4x4xf32, #tpu.memory_space<vmem>>, vector<4x4xf32>
    %cst_31 = arith.constant dense<0.000000e+00> : vector<4x256xf32>
    %128 = tpu.matmul %127, %126, %cst_31 {dimension_numbers = #tpu.dot_dimension_numbers<[1], [0], [0], [1], [0, 0, 1, 1], [], []>} : vector<4x4xf32>, vector<4x256xf32>, vector<4x256xf32> -> vector<4x256xf32>
    %c0_32 = arith.constant 0 : index
    %c0_33 = arith.constant 0 : index
    %129 = vector.load %arg11[%c0_32, %c0_33] : memref<4x1xf32, #tpu.memory_space<vmem>>, vector<4x1xf32>
    %130 = vector.broadcast %129 : vector<4x1xf32> to vector<4x256xf32>
    %131 = arith.addf %128, %130 : vector<4x256xf32>
    %132 = arith.mulf %1, %131 : vector<4x256xf32>
    %c0_34 = arith.constant 0 : index
    %c0_35 = arith.constant 0 : index
    %c0_36 = arith.constant 0 : index
    %133 = vector.load %arg12[%c0_34, %c0_35, %c0_36] : memref<1x4x256xf32, #tpu.memory_space<vmem>>, vector<1x4x256xf32>
    %134 = vector.shape_cast %133 : vector<1x4x256xf32> to vector<4x256xf32>
    %135 = vector.shape_cast %132 : vector<4x256xf32> to vector<1x4x256xf32>
    tpu.vector_store %arg12[%c0_34, %c0_35, %c0_36], %135 {strides = array<i32>} : memref<1x4x256xf32, #tpu.memory_space<vmem>>, vector<1x4x256xf32>,
    return
  }
  func.func @transform_0(%arg0: i32) -> (i32, i32, i32) {
    %c0_i32 = arith.constant 0 : i32
    %c0_i32_0 = arith.constant 0 : i32
    %c0_i32_1 = arith.constant 0 : i32
    return %arg0, %c0_i32, %c0_i32_0 : i32, i32, i32
  }
  func.func @transform_1(%arg0: i32) -> (i32, i32) {
    %c0_i32 = arith.constant 0 : i32
    %c0_i32_0 = arith.constant 0 : i32
    %c0_i32_1 = arith.constant 0 : i32
    return %c0_i32, %c0_i32_0 : i32, i32
  }
  func.func @transform_2(%arg0: i32) -> (i32, i32) {
    %c0_i32 = arith.constant 0 : i32
    %c0_i32_0 = arith.constant 0 : i32
    %c0_i32_1 = arith.constant 0 : i32
    return %c0_i32, %c0_i32_0 : i32, i32
  }
  func.func @transform_3(%arg0: i32) -> (i32, i32) {
    %c0_i32 = arith.constant 0 : i32
    %c0_i32_0 = arith.constant 0 : i32
    %c0_i32_1 = arith.constant 0 : i32
    return %c0_i32, %c0_i32_0 : i32, i32
  }
  func.func @transform_4(%arg0: i32) -> (i32, i32) {
    %c0_i32 = arith.constant 0 : i32
    %c0_i32_0 = arith.constant 0 : i32
    %c0_i32_1 = arith.constant 0 : i32
    return %c0_i32, %c0_i32_0 : i32, i32
  }
  func.func @transform_5(%arg0: i32) -> (i32, i32) {
    %c0_i32 = arith.constant 0 : i32
    %c0_i32_0 = arith.constant 0 : i32
    %c0_i32_1 = arith.constant 0 : i32
    return %c0_i32, %c0_i32_0 : i32, i32
  }
  func.func @transform_6(%arg0: i32) -> (i32, i32) {
    %c0_i32 = arith.constant 0 : i32
    %c0_i32_0 = arith.constant 0 : i32
    %c0_i32_1 = arith.constant 0 : i32
    return %c0_i32, %c0_i32_0 : i32, i32
  }
  func.func @transform_7(%arg0: i32) -> (i32, i32) {
    %c0_i32 = arith.constant 0 : i32
    %c0_i32_0 = arith.constant 0 : i32
    %c0_i32_1 = arith.constant 0 : i32
    return %c0_i32, %c0_i32_0 : i32, i32
  }
  func.func @transform_8(%arg0: i32) -> (i32, i32) {
    %c0_i32 = arith.constant 0 : i32
    %c0_i32_0 = arith.constant 0 : i32
    %c0_i32_1 = arith.constant 0 : i32
    return %c0_i32, %c0_i32_0 : i32, i32
  }
  func.func @transform_9(%arg0: i32) -> (i32, i32) {
    %c0_i32 = arith.constant 0 : i32
    %c0_i32_0 = arith.constant 0 : i32
    %c0_i32_1 = arith.constant 0 : i32
    return %c0_i32, %c0_i32_0 : i32, i32
  }
  func.func @transform_10(%arg0: i32) -> (i32, i32) {
    %c0_i32 = arith.constant 0 : i32
    %c0_i32_0 = arith.constant 0 : i32
    %c0_i32_1 = arith.constant 0 : i32
    return %c0_i32, %c0_i32_0 : i32, i32
  }
  func.func @transform_11(%arg0: i32) -> (i32, i32, i32) {
    %c0_i32 = arith.constant 0 : i32
    %c0_i32_0 = arith.constant 0 : i32
    %c0_i32_1 = arith.constant 0 : i32
    return %arg0, %c0_i32, %c0_i32_0 : i32, i32, i32
  }
}

</mosaic_0001>

<bundles_post_ra>
// kernel: tpu_custom_call.1
= control target key start
LH: loop header
LB: loop body
LE: loop exit
PB: predicated region body
PF: predicated region fallthrough
CT: control target
= control target key end

     0   :  { %16 = vsyncpa [#allocation3], 0  ;;  %s1318_s0 = inlined_call_operand.hbm [shape: f32[2,4,256], index: 0, kind: input, shape index: {}]   ;;  %s1319_s1 = inlined_call_operand.vmem [shape: f32[4,3], index: 1, kind: input, shape index: {}]   ;;  %s1320_s2 = inlined_call_operand.vmem [shape: f32[4,1], index: 2, kind: input, shape index: {}]   ;;  %s1321_s3 = inlined_call_operand.vmem [shape: f32[4,3], index: 3, kind: input, shape index: {}]   ;;  %s1322_s4 = inlined_call_operand.vmem [shape: f32[4,1], index: 4, kind: input, shape index: {}]   ;;  %s1323_s5 = inlined_call_operand.vmem [shape: f32[4,3], index: 5, kind: input, shape index: {}]   ;;  %s1324_s6 = inlined_call_operand.vmem [shape: f32[4,1], index: 6, kind: input, shape index: {}]   ;;  %s1325_s7 = inlined_call_operand.vmem [shape: f32[4,3], index: 7, kind: input, shape index: {}]   ;;  %s1326_s8 = inlined_call_operand.vmem [shape: f32[4,1], index: 8, kind: input, shape index: {}]   ;;  %s1327_s9 = inlined_call_operand.vmem [shape: f32[4,4], index: 9, kind: input, shape index: {}]   ;;  %s1328_s10 = inlined_call_operand.vmem [shape: f32[4,1], index: 10, kind: input, shape index: {}]   ;;  %s1329_s11 = inlined_call_operand.hbm [shape: f32[2,4,256], index: 11, kind: output, shape index: {}]  }
   0x1   :  { %18 = vsyncpa [#allocation3 + $0x1], 0 }
   0x2   :  { %19 = vsyncpa [#allocation4], 0 }
   0x3   :  { %21 = vsyncpa [#allocation4 + $0x1], 0  ;;  %s1106_s17 = smov 0   ;;  %s1108_s18 = smov 0  }
   0x4   :  { %s1110_s19 = smov 0   ;;  %s1112_s20 = smov 0  }
   0x5 LB: > { %1335 = sst [smem:[#allocation8_spill]] %s1020_s17  ;;  %s1127_s21 = sadd.s32 4294967295, %s1032_s20   ;;  %s1032_s20 = sphi %s1112_s20, %s1348_s20   ;;  %s1028_s19 = sphi %s1110_s19, %s1350_s19   ;;  %s1024_s18 = sphi %s1108_s18, %s1352_s18   ;;  %s1020_s17 = sphi %s1106_s17, %s1351_s17  }
   0x6   : > { %1336 = sst [smem:[#allocation9_spill]] %s1028_s19  ;;  %s835_s22 = sadd.s32 4294967294, %s1032_s20  }
   0x7   : > { %s1131_s23 = sadd.s32 1, %s1032_s20   ;;  %s34_s24 = sadd.s32 1, %s1028_s19 }
   0x8   : > { %1337 = sst [smem:[#allocation10_spill]] %s1131_s23  ;;  %s31_s25 = ssub.s32 %s1032_s20, %s1131_s23 }
   0x9   : > { %p41_p0 = scmp.ne.s32.totalorder %s1028_s19, %s1024_s18  ;;  %p32_p1 = scmp.eq.s32.totalorder %s31_s25, 0 }
   0xa   : > { %p42_p2 = scmp.eq.s32.totalorder %s1032_s20, 0  ;;  %p47_p3 = scmp.ne.s32.totalorder %s1024_s18, %s1020_s17 }
   0xb   : > { %p48_p4 = scmp.eq.s32.totalorder %s1127_s21, 0  ;;  %p281_p7 = scmp.eq.s32.totalorder %s1127_s21, 1 }
   0xc   : > { %s1143_s26 = scalar_select %p32_p1, %s1028_s19, %s34_s24  }
   0xd   : > { %p1145_p5 = por %p42_p2, %p41_p0  ;;  %p1149_p6 = por %p48_p4, %p47_p3 }
   0xe   : > { %1338 = sst [smem:[#allocation11_spill]] %s1143_s26  ;;  %p287_p8 = scmp.eq.s32.totalorder %s835_s22, 1 }
   0xf   : > { %p875_p10 = scmp.lt.s32.totalorder %s1032_s20, 2  ;;  %p1156_p11 = por %p281_p7, %p41_p0 }
  0x10   : > { %p1160_p12 = por %p287_p8, %p47_p3  ;;  %s337_s12 = sand.u32 1, %s1028_s19  }
  0x11   : > { %s861_s13 = sshll.u32 %s1032_s20, 3  ;;  %s838_s14 = sshll.u32 %s337_s12, 3 }
  0x12   : > { %s1342_s30 = scalar_select %p1160_p12, 1, 0 }
  0x13   : > { %s346_s24 = scalar_lea.hbm %s1318_s0, %s861_s13  ;;  %s341_s22 = scalar_lea.vmem [#allocation2], %s838_s14 }
  0x14   : > { %1343 = sst [smem:[#allocation12_spill]] %s1342_s30  ;;  %s348_s25 = sshll.u32 %s346_s24, 4  ;;  %s349_s25 = int_to_ptr.hbm [resolvable:$true] %s348_s25 }
  0x15   : > { %s350_s26 = sshll.u32 %s341_s22, 4  ;;  %p1171_p13 = pnand %p875_p10, %p1145_p5  ;;  %s351_s26 = int_to_ptr.vmem [resolvable:$true] %s350_s26 }
  0x16   : > { %p841_p0 = scmp.ge.s32.totalorder %s1032_s20, 1  ;;  %p355_p1 = scmp.lt.s32.totalorder %s1032_s20, 3 }
  0x17   : > { %s338_s19 = scalar_lea.sflag [#allocation3], %s337_s12  ;;  %s936_s30 = sshra.s32 %s349_s25, 4  ;;  %s937_s30 = int_to_ptr.hbm [resolvable:$true] %s936_s30 }
  0x18   : > { %s938_s17 = scalar_lea.hbm %s937_s30, 8  ;;  %p940_p3 = pneg %p1171_p13 }
  0x19   : > { %p939_p2 = scmp.ne.s32.totalorder %s937_s30, %s938_s17  ;;  %s943_s27 = scalar_lea.hbm %s1318_s0, 16 }
  0x1a   : > { %p944_p5 = scmp.lt.s32.totalorder %s937_s30, %s1318_s0  ;;  %p945_p8 = scmp.lt.s32.totalorder %s943_s27, %s938_s17 }
  0x1b   : > { %p941_p4 = pnand %p940_p3, %p939_p2 }
  0x1c   : > { %p946_p10 = por %p945_p8, %p944_p5 }
  0x1d   : > { %p942_p7 = pneg %p941_p4 }
  0x1f   : > { %p947_p9 = pnand %p946_p10, %p942_p7 }
  0x21   : > { %950 = shalt.err (!%p947_p9)
}
  0x22   : > { %870 = dma.hbm_to_vmem [thread:$0]  (!%p1171_p13), %s349_s25, 128, %s351_s26, %s338_s19  }
  0x23   : > { %p356_p2 = pnand %p841_p0, %p355_p1 }
  0x24   : > { %s1192_s12 = sand.u32 (!%p356_p2), 1, %s1024_s18  }
  0x25   : > { %359 = sbr.rel (%p356_p2) target bundleno = 741 (0x2e5), region = 64  ;;  %s842_s17 = sshll.u32 (!%p356_p2), %s1192_s12, 3 }
  0x26   : > { %s362_s30 = scalar_lea.sflag (!%p356_p2), [#allocation3], %s1192_s12  ;;  %s365_s24 = scalar_lea.vmem (!%p356_p2), [#allocation2], %s842_s17 }
  0x2a   : > { %1011 = dma.done.wait (%p1149_p6), %s362_s30, 128  }
  0x2b   : > { %1013 = vsyncadd (%p1149_p6), %s362_s30, 4294967168  ;;  %v1034_v0 = vmov 2   ;;  %v1035_v1 = vmov 0   ;;  %v1205_v2 = vld [vmem:[%s365_s24] sm:$0xff]  ;;  %v433_v3 = vld [vmem:[%s1319_s1] sm:$0xf]  ;;  %v406_v11 = vlaneseq }
  0x2c   : > { %923 = vset.pattern.permute.xlu0 %v1034_v0  ;;  %921 = vset.pattern.permute.xlu2 %v1035_v1  ;;  %435 = vst [vmem:[#allocation1] ss:$2 sm:$0xff] %v1205_v2  ;;  %s1036_s26 = smov 1   ;;  %v1037_v6 = vmov 1   ;;  %s1038_s28 = smov 127   ;;  %vm442_vm0 = vcmask 7168  }
  0x2d   : > { %924 = vset.pattern.permute.xlu1 %v1035_v1  ;;  %477 = vperm.xlu2 %921, %v433_v3   ;;  %v1217_v9 = vld [vmem:[%s1321_s3] sm:$0xf]  ;;  %v407_v12 = vand.u32 127, %v406_v11  ;;  %v1039_v20 = vmov 0.0   ;;  %vm462_vm5 = vcmask 1039360   ;;  %s1040_s27 = smov 16  }
  0x2e   : > { %v503_v10 = vld [vmem:[%s1320_s2] sm:$0xf]  ;;  %s1041_s15 = smov 112   ;;  %vm518_vm6 = vcmask 130048   ;;  %vm527_vm7 = vcmask 916480   ;;  %s1042_s24 = smov 2  }
  0x2f   : > { %v408_v13 = vadd.s32 128, %v407_v12  ;;  %v1228_v15 = vand.u32 15, %v407_v12  ;;  %v555_v51 = vld [vmem:[%s1322_s4] sm:$0xf]  ;;  %s1043_s19 = smov 126   ;;  %vm570_vm8 = vcmask 15360  }
  0x30   : > { %vm587_vm11 = vcmask 1031168   ;;  %s1044_s14 = smov 32   ;;  %s1045_s16 = smov 96   ;;  %vm638_vm14 = vcmask 261120   ;;  %vm647_vm15 = vcmask 785408  }
  0x31   : > { %v1230_v16 = vand.u32 15, %v408_v13  ;;  %vm447_vm1 = vcmp.ge.s32.totalorder %v1228_v15, 1  ;;  %vm467_vm3 = vcmp.lt.s32.totalorder %v1228_v15, 15  ;;  %vm575_vm9 = vcmp.ge.s32.totalorder %v1228_v15, 2  ;;  %s404_s13 = scalar_lea.vmem [#allocation5], %s842_s17  ;;  %s986_s17 = scalar_lea.hbm %s1329_s11, 16 }
  0x32   : > { %v844_v21 = vsel %vm447_vm1, 1.0, %v1039_v20  ;;  %v846_v30 = vsel %vm467_vm3, 1.0, %v1039_v20  ;;  %vm592_vm12 = vcmp.lt.s32.totalorder %v1228_v15, 14  ;;  %vm690_vm1 = vcmask 31744  }
  0x33   : > { %v436_v4 = vld.sshfl [vmem:[#allocation1] sm:$0xff pattern:$0x75316420]  ;;  %v437_v5 = vld.sshfl [vmem:[#allocation1 + $0x8] sm:$0xff pattern:$0x75316420] }
  0x34   : > { %438 = vrot.lane.b32.xlu0 %v436_v4, %s1036_s26  ;;  %455 = vst [vmem:[#allocation1] ss:$2 sm:$0xff] %v1205_v2  ;;  %vm448_vm2 = vcmp.ge.s32.totalorder %v1230_v16, 1  ;;  %vm468_vm4 = vcmp.lt.s32.totalorder %v1230_v16, 15  ;;  %vm576_vm10 = vcmp.ge.s32.totalorder %v1230_v16, 2  ;;  %vm593_vm13 = vcmp.lt.s32.totalorder %v1230_v16, 14 }
  0x35   : > { %922 = vset.pattern.permute.xlu2 %v1037_v6  ;;  %v845_v23 = vsel %vm448_vm2, 1.0, %v1039_v20  ;;  %v847_v31 = vsel %vm468_vm4, 1.0, %v1039_v20 }
  0x36   : > { %483 = vperm.xlu2 %922, %v433_v3  }
  0x3b   : > { %v456_v7 = vld.sshfl [vmem:[#allocation1] sm:$0xff pattern:$0x75316420]  ;;  %v457_v8 = vld.sshfl [vmem:[#allocation1 + $0x8] sm:$0xff pattern:$0x75316420] }
  0x3c   : > { %440 = vrot.lane.b32.xlu0 %v437_v5, %s1036_s26  ;;  %458 = vrot.lane.b32.xlu1 %v456_v7, %s1038_s28  ;;  %486 = vst [vmem:[#allocation1] ss:$2 sm:$0xff] %v1205_v2  ;;  %s862_s26 = sshll.u32 %s1127_s21, 3  ;;  %s749_s21 = scalar_lea.sflag [#allocation4], %s1192_s12 }
  0x3d   : > { %s760_s22 = scalar_lea.hbm %s1329_s11, %s862_s26 }
  0x3e   : > { %925 = vset.pattern.permute.xlu2 %v1035_v1 }
  0x3f   : > { %534 = vperm.xlu2 %925, %v1217_v9  }
  0x43   : > { %v487_v28 = vld.sshfl [vmem:[#allocation1] sm:$0xff pattern:$0x75316420]  ;;  %v488_v29 = vld.sshfl [vmem:[#allocation1 + $0x8] sm:$0xff pattern:$0x75316420] }
  0x44   : > { %460 = vrot.lane.b32.xlu1 %v457_v8, %s1038_s28  ;;  %496 = vperm.xlu0 %923, %v433_v3  }
  0x4c   : > { %506 = vperm.xlu1 %924, %v503_v10   ;;  %926 = vset.pattern.permute.xlu0 %v1037_v6 }
  0x4d   : > { %540 = vperm.xlu0 %926, %v1217_v9  }
  0x54   : > { %927 = vset.pattern.permute.xlu1 %v1034_v0 }
  0x55   : > { %930 = vset.pattern.permute.xlu0 %v1034_v0 }
  0x87   : > { %v478_v17 = vpop.permute.xlu2 %477 }
  0x90   : > { %v484_v27 = vpop.permute.xlu2 %483 }
  0x91   : > { %v491_v33 = vmul.f32 %v487_v28, %v484_v27  ;;  %v492_v34 = vmul.f32 %v488_v29, %v484_v27 }
  0x99   : > { %v535_v52 = vpop.permute.xlu2 %534 }
  0xa6   : > { %v439_v14 = vpop.permute.xlu0 %438 }
  0xa7   : > { %v446_v22 = vsel %vm442_vm0, 0.0, %v439_v14 }
  0xa8   : > { %v453_v25 = vmul.f32 %v844_v21, %v446_v22  ;;  %v631_v21 = vld [vmem:[%s1325_s7] sm:$0xf] }
  0xaa   : > { %v480_v32 = vmul.f32 %v478_v17, %v453_v25  ;;  %v848_v25 = vsel %vm575_vm9, 1.0, %v1039_v20 }
  0xac   : > { %v493_v42 = vadd.f32 %v491_v33, %v480_v32  ;;  %v851_v32 = vsel %vm593_vm13, 1.0, %v1039_v20 }
  0xae   : > { %v441_v18 = vpop.permute.xlu0 %440  ;;  %v459_v19 = vpop.permute.xlu1 %458 }
  0xaf   : > { %v443_v24 = vsel %vm442_vm0, %v439_v14, %v441_v18  ;;  %v563_v18 = vld [vmem:[%s1323_s5] sm:$0xf]  ;;  %vm694_vm0 = vcmask 1043456  }
  0xb0   : > { %v454_v26 = vmul.f32 %v845_v23, %v443_v24 }
  0xb2   : > { %v481_v35 = vmul.f32 %v478_v17, %v454_v26 }
  0xb4   : > { %v494_v45 = vadd.f32 %v492_v34, %v481_v35 }
  0xb6   : > { %v461_v36 = vpop.permute.xlu1 %460  ;;  %v497_v39 = vpop.permute.xlu0 %496 }
  0xb7   : > { %v463_v37 = vsel %vm462_vm5, %v459_v19, %v461_v36  ;;  %v466_v38 = vsel %vm462_vm5, %v461_v36, 0.0  ;;  %v623_v19 = vld [vmem:[%s1324_s6] sm:$0xf] }
  0xb8   : > { %v473_v40 = vmul.f32 %v846_v30, %v463_v37  ;;  %v474_v41 = vmul.f32 %v847_v31, %v466_v38  ;;  %v850_v31 = vsel %vm592_vm12, 1.0, %v1039_v20 }
  0xba   : > { %v499_v43 = vmul.f32 %v497_v39, %v473_v40  ;;  %v500_v44 = vmul.f32 %v497_v39, %v474_v41 }
  0xbc   : > { %v501_v46 = vadd.f32 %v499_v43, %v493_v42  ;;  %v502_v47 = vadd.f32 %v500_v44, %v494_v45 }
  0xbe   : > { %v507_v48 = vpop.permute.xlu1 %506 }
  0xbf   : > { %v509_v49 = vadd.f32 %v507_v48, %v501_v46  ;;  %v510_v50 = vadd.f32 %v507_v48, %v502_v47  ;;  %v541_v58 = vpop.permute.xlu0 %540 }
  0xc1   : > { %516 = vrot.lane.b32.xlu1 %v510_v50, %s1040_s27  ;;  %514 = vrot.lane.b32.xlu2 %v509_v49, %s1040_s27  ;;  %v543_v62 = vmul.f32 %v541_v58, %v509_v49  ;;  %v544_v63 = vmul.f32 %v541_v58, %v510_v50  ;;  %s764_s27 = sshll.u32 %s760_s22, 4  ;;  %s765_s27 = int_to_ptr.hbm [resolvable:$true] %s764_s27 }
  0xc9   : > { %523 = vrot.lane.b32.xlu1 %v509_v49, %s1041_s15  ;;  %525 = vrot.lane.b32.xlu2 %v510_v50, %s1041_s15  ;;  %s980_s15 = sshra.s32 %s765_s27, 4  ;;  %s981_s15 = int_to_ptr.hbm [resolvable:$true] %s980_s15 }
  0xca   : > { %p987_p0 = scmp.lt.s32.totalorder %s981_s15, %s1329_s11 }
  0xd1   : > { %548 = vperm.xlu1 %927, %v1217_v9   ;;  %558 = vperm.xlu2 %925, %v555_v51   ;;  %v684_v51 = vld [vmem:[%s1328_s10] sm:$0xf] }
  0xd9   : > { %928 = vset.pattern.permute.xlu1 %v1035_v1  ;;  %929 = vset.pattern.permute.xlu2 %v1037_v6 }
 0x11b   : > { %v515_v54 = vpop.permute.xlu2 %514 }
 0x11c   : > { %v522_v56 = vsel %vm518_vm6, 0.0, %v515_v54 }
 0x11d   : > { %v537_v60 = vmul.f32 %v535_v52, %v522_v56 }
 0x11f   : > { %v545_v7 = vadd.f32 %v543_v62, %v537_v60 }
 0x123   : > { %v526_v59 = vpop.permute.xlu2 %525 }
 0x124   : > { %v531_v3 = vsel %vm527_vm7, %v526_v59, 0.0 }
 0x12b   : > { %v559_v13 = vpop.permute.xlu2 %558 }
 0x133   : > { %v517_v53 = vpop.permute.xlu1 %516 }
 0x134   : > { %v519_v57 = vsel %vm518_vm6, %v515_v54, %v517_v53 }
 0x135   : > { %v538_v61 = vmul.f32 %v535_v52, %v519_v57 }
 0x137   : > { %v546_v8 = vadd.f32 %v544_v63, %v538_v61 }
 0x13b   : > { %v524_v55 = vpop.permute.xlu1 %523 }
 0x13c   : > { %v528_v4 = vsel %vm527_vm7, %v524_v55, %v526_v59 }
 0x143   : > { %v549_v5 = vpop.permute.xlu1 %548 }
 0x144   : > { %v551_v9 = vmul.f32 %v549_v5, %v528_v4  ;;  %v552_v10 = vmul.f32 %v549_v5, %v531_v3 }
 0x146   : > { %v553_v11 = vadd.f32 %v551_v9, %v545_v7  ;;  %v554_v12 = vadd.f32 %v552_v10, %v546_v8  ;;  %v683_v7 = vld [vmem:[%s1327_s9] sm:$0xf] }
 0x148   : > { %v562_v14 = vadd.f32 %v559_v13, %v554_v12  ;;  %v561_v17 = vadd.f32 %v559_v13, %v553_v11 }
 0x14a   : > { %568 = vrot.lane.b32.xlu1 %v562_v14, %s1042_s24  ;;  %583 = vrot.lane.b32.xlu2 %v561_v17, %s1043_s19 }
 0x14b   : > { %566 = vrot.lane.b32.xlu0 %v561_v17, %s1042_s24 }
 0x152   : > { %602 = vperm.xlu1 %928, %v563_v18   ;;  %608 = vperm.xlu2 %929, %v563_v18  }
 0x153   : > { %585 = vrot.lane.b32.xlu0 %v562_v14, %s1043_s19 }
 0x15a   : > { %626 = vperm.xlu1 %928, %v623_v19   ;;  %931 = vset.pattern.permute.xlu2 %v1035_v1 }
 0x15b   : > { %616 = vperm.xlu0 %930, %v563_v18   ;;  %654 = vperm.xlu2 %931, %v631_v21  }
 0x163   : > { %932 = vset.pattern.permute.xlu0 %v1037_v6  ;;  %933 = vset.pattern.permute.xlu2 %v1034_v0  ;;  %v849_v6 = vsel %vm576_vm10, 1.0, %v1039_v20  ;;  %v675_v20 = vld [vmem:[%s1326_s8] sm:$0xf] }
 0x164   : > { %660 = vperm.xlu0 %932, %v631_v21   ;;  %668 = vperm.xlu2 %933, %v631_v21  }
 0x16c   : > { %934 = vset.pattern.permute.xlu2 %v1035_v1  ;;  %935 = vset.pattern.permute.xlu0 %v1035_v1 }
 0x16d   : > { %687 = vperm.xlu0 %935, %v684_v51  }
 0x1a4   : > { %v584_v24 = vpop.permute.xlu2 %583 }
 0x1ac   : > { %v609_v30 = vpop.permute.xlu2 %608 }
 0x1ad   : > { %v611_v37 = vmul.f32 %v609_v30, %v561_v17  ;;  %v612_v38 = vmul.f32 %v609_v30, %v562_v14 }
 0x1b5   : > { %v655_v49 = vpop.permute.xlu2 %654 }
 0x1bc   : > { %v569_v22 = vpop.permute.xlu1 %568 }
 0x1bd   : > { %v567_v23 = vpop.permute.xlu0 %566 }
 0x1be   : > { %v571_v26 = vsel %vm570_vm8, %v567_v23, %v569_v22  ;;  %v574_v0 = vsel %vm570_vm8, 0.0, %v567_v23  ;;  %v669_v50 = vpop.permute.xlu2 %668 }
 0x1bf   : > { %v581_v28 = vmul.f32 %v848_v25, %v574_v0  ;;  %v582_v29 = vmul.f32 %v849_v6, %v571_v26 }
 0x1c4   : > { %v603_v1 = vpop.permute.xlu1 %602 }
 0x1c5   : > { %v586_v27 = vpop.permute.xlu0 %585  ;;  %v605_v35 = vmul.f32 %v603_v1, %v581_v28  ;;  %v606_v36 = vmul.f32 %v603_v1, %v582_v29 }
 0x1c6   : > { %v588_v33 = vsel %vm587_vm11, %v584_v24, %v586_v27  ;;  %v591_v34 = vsel %vm587_vm11, %v586_v27, 0.0 }
 0x1c7   : > { %v598_v39 = vmul.f32 %v850_v31, %v588_v33  ;;  %v599_v40 = vmul.f32 %v851_v32, %v591_v34  ;;  %v613_v15 = vadd.f32 %v611_v37, %v605_v35  ;;  %v614_v42 = vadd.f32 %v612_v38, %v606_v36 }
 0x1cc   : > { %v627_v46 = vpop.permute.xlu1 %626 }
 0x1cd   : > { %v617_v41 = vpop.permute.xlu0 %616 }
 0x1ce   : > { %v619_v16 = vmul.f32 %v617_v41, %v598_v39  ;;  %v620_v43 = vmul.f32 %v617_v41, %v599_v40 }
 0x1d0   : > { %v621_v44 = vadd.f32 %v619_v16, %v613_v15  ;;  %v622_v45 = vadd.f32 %v620_v43, %v614_v42 }
 0x1d2   : > { %v630_v47 = vadd.f32 %v627_v46, %v622_v45  ;;  %v629_v48 = vadd.f32 %v627_v46, %v621_v44 }
 0x1d4   : > { %636 = vrot.lane.b32.xlu1 %v630_v47, %s1044_s14  ;;  %634 = vrot.lane.b32.xlu2 %v629_v48, %s1044_s14  ;;  %s762_s14 = sshll.u32 %s404_s13, 4  ;;  %s763_s14 = int_to_ptr.vmem [resolvable:$true] %s762_s14 }
 0x1d6   : > { %v661_v55 = vpop.permute.xlu0 %660 }
 0x1d7   : > { %v664_v57 = vmul.f32 %v661_v55, %v630_v47  ;;  %v663_v8 = vmul.f32 %v661_v55, %v629_v48 }
 0x1dc   : > { %645 = vrot.lane.b32.xlu1 %v630_v47, %s1045_s16  ;;  %678 = vperm.xlu2 %934, %v675_v20  }
 0x1df   : > { %v688_v18 = vpop.permute.xlu0 %687 }
 0x1e4   : > { %643 = vrot.lane.b32.xlu1 %v629_v48, %s1045_s16  ;;  %s982_s16 = scalar_lea.hbm %s981_s15, 8 }
 0x1e5   : > { %p983_p6 = scmp.ne.s32.totalorder %s981_s15, %s982_s16  ;;  %p988_p1 = scmp.lt.s32.totalorder %s986_s17, %s982_s16 }
 0x1e7   : > { %p984_p9 = pnand %p983_p6, %p1156_p11  ;;  %p989_p3 = por %p988_p1, %p987_p0 }
 0x1e9   : > { %p985_p13 = pneg %p984_p9 }
 0x1eb   : > { %p990_p4 = pnand %p989_p3, %p985_p13 }
 0x22e   : > { %v635_v53 = vpop.permute.xlu2 %634 }
 0x22f   : > { %v642_v62 = vsel %vm638_vm14, 0.0, %v635_v53 }
 0x230   : > { %v657_v4 = vmul.f32 %v655_v49, %v642_v62 }
 0x232   : > { %v665_v11 = vadd.f32 %v663_v8, %v657_v4 }
 0x236   : > { %v679_v63 = vpop.permute.xlu2 %678 }
 0x246   : > { %v637_v52 = vpop.permute.xlu1 %636 }
 0x247   : > { %v639_v54 = vsel %vm638_vm14, %v635_v53, %v637_v52 }
 0x248   : > { %v658_v56 = vmul.f32 %v655_v49, %v639_v54 }
 0x24a   : > { %v666_v61 = vadd.f32 %v664_v57, %v658_v56 }
 0x24e   : > { %v646_v58 = vpop.permute.xlu1 %645 }
 0x24f   : > { %v651_v59 = vsel %vm647_vm15, %v646_v58, 0.0 }
 0x250   : > { %v672_v60 = vmul.f32 %v669_v50, %v651_v59 }
 0x252   : > { %v674_v3 = vadd.f32 %v672_v60, %v666_v61 }
 0x254   : > { %v682_v5 = vadd.f32 %v679_v63, %v674_v3 }
 0x256   : > { %v644_v9 = vpop.permute.xlu1 %643  ;;  %854 = vmatpush.msk.msra.mxu1 %vm694_vm0, %v682_v5 }
 0x257   : > { %v648_v10 = vsel %vm647_vm15, %v644_v9, %v646_v58  ;;  %855 = vmatmul.msk.f32.vlgmr.msra.gmra.mxu1 %vm690_vm1, %v683_v7 }
 0x258   : > { %v671_v12 = vmul.f32 %v669_v50, %v648_v10 }
 0x25a   : > { %v673_v13 = vadd.f32 %v671_v12, %v665_v11 }
 0x25c   : > { %v681_v14 = vadd.f32 %v679_v63, %v673_v13 }
 0x25e   : > { %852 = vmatpush.msk.msra.mxu0 %vm694_vm0, %v681_v14 }
 0x25f   : > { %853 = vmatmul.msk.f32.vlgmr.msra.gmra.mxu0 %vm690_vm1, %v683_v7 }
 0x2d4   : > { %v738_v17 = vpop.f32.mrf.mxu1 }
 0x2d5   : > { %v739_v19 = vadd.f32 %v738_v17, %v688_v18 }
 0x2d7   : > { %v743_v21 = vrot.slane %v739_v19, 4 }
 0x2dc   : > { %v718_v22 = vpop.f32.mrf.mxu0 }
 0x2dd   : > { %v719_v23 = vadd.f32 %v718_v22, %v688_v18 }
 0x2df   : > { %v744_v24 = vsel %vm694_vm0, %v719_v23, %v743_v21 }
 0x2e0   : > { %v746_v25 = vmul.f32 %v744_v24, %v1205_v2 }
 0x2e2   : > { %747 = vst [vmem:[%s404_s13] sm:$0xff] %v746_v25 }
 0x2e3   : > { %993 = shalt.err (!%p990_p4)
}
 0x2e4   : > { %865 = dma.vmem_to_hbm [thread:$0]  (%p1156_p11), %s763_s14, 128, %s765_s27, %s749_s21  }
 0x2e5 PF: > { %s1345_s12 = sld [smem:[#allocation8_spill]]  ;;  %p1347_p7 = scmp.ge.s32.totalorder %s1032_s20, 2 }
 0x2e7   : > { %p872_p5 = pnand %p1347_p7, %p1160_p12 }
 0x2e9   : > { %p873_p8 = pneg %p872_p5 }
 0x2eb   : > { %s776_s28 = sand.u32 1, %s1345_s12  }
 0x2ec   : > { %s777_s25 = scalar_lea.sflag [#allocation4], %s776_s28 }
 0x2ed   : > { %1015 = dma.done.wait (%p873_p8), %s777_s25, 128  }
 0x2ee   : > { %1017 = vsyncadd (%p873_p8), %s777_s25, 4294967168  ;;  %s1348_s20 = sld [smem:[#allocation10_spill]]  ;;  %s1351_s17 = smov %s1024_s18 }
 0x2ef   : > { %s1349_s22 = sld [smem:[#allocation9_spill]] }
 0x2f0   : > { %s1350_s19 = sld [smem:[#allocation11_spill]] }
 0x2f4   : > { %p24_p10 = scmp.ge.s32.totalorder %s1348_s20, 4  }
 0x2f5   : > { %s1352_s18 = smov %s1349_s22 }
 0x2f6   :  { %26 = sbr.rel (!%p24_p10) target bundleno = 5 (0x5), region = 109 }
 0x2fb   :  { %783 = vsyncpa [#allocation3], 1 }
 0x2fc   :  { %785 = vsyncpa [#allocation3 + $0x1], 1 }
 0x2fd   :  { %786 = vsyncpa [#allocation4], 1 }
 0x2fe   :  { %788 = vsyncpa [#allocation4 + $0x1], 1 }

</bundles_post_ra>
